<compile_context>
chip_gen: v6e
topology: v6e:2x2x1
jax: 0.10.0
libtpu: 0.0.40
codegen_flags: <defaults>
</compile_context>

<pallas_src>
import functools

import numpy as np

import jax
import jax.numpy as jnp
from jax.experimental import pallas as pl
from jax.experimental.pallas import tpu as pltpu


def _round_up(x: int, m: int) -> int:
    return ((x + m - 1) // m) * m


def _freq_bands(n_freqs: int, log_space: bool) -> np.ndarray:
    if log_space:
        return (2.0 ** np.linspace(0.0, n_freqs - 1, n_freqs)).astype(np.float32)
    return np.linspace(2.0 ** 0.0, 2.0 ** (n_freqs - 1), n_freqs, dtype=np.float32)


def _posenc_kernel(x_ref, o_ref, *, freqs: tuple):
    """One grid step, feature-major (lane-dense) layout.

    x_ref : VMEM (d_input, TILE_N)  input tile  (points on the lane axis).
    o_ref : VMEM (d_output, TILE_N) output tile.
    freqs : compile-time Python float frequencies (baked into the kernel).
    """
    d_input = x_ref.shape[0]
    x = x_ref[...]
    xf32 = x.astype(jnp.float32)

    # Identity slab.
    o_ref[0:d_input, :] = x.astype(o_ref.dtype)

    # Per-frequency sin/cos slabs, stored as they are produced (static offsets).
    for k, f in enumerate(freqs):            # static unroll; f is a Python float
        arg = xf32 * f
        off = (1 + 2 * k) * d_input
        o_ref[off:off + d_input, :] = jnp.sin(arg).astype(o_ref.dtype)
        o_ref[off + d_input:off + 2 * d_input, :] = jnp.cos(arg).astype(o_ref.dtype)


def _choose_tile_n(n: int, tile_n_max: int) -> int:
    """Lane-axis tile: full extent for small N, else multiples of 512 capped so
    the grid has >= 8 steps (v7x megacore / pipeline warmup amortization)."""
    if n <= 1024:
        return max(n, 1)                     # single block == full array extent
    target = _round_up(-(-n // 8), 512)      # ceil(n/8) rounded up to 512
    return max(512, min(tile_n_max, target))


def make_positional_encoder(d_input: int, n_freqs: int, log_space: bool = False,
                            tile_n_max: int = 16384):
    """Returns (apply_fn, d_output). apply_fn(x: [..., d_input]) -> [..., d_output]."""
    freqs = tuple(float(f) for f in _freq_bands(n_freqs, log_space))
    d_output = d_input * (1 + 2 * n_freqs)
    kernel = functools.partial(_posenc_kernel, freqs=freqs)

    def apply(x):
        assert x.shape[-1] == d_input, x.shape
        lead_shape = x.shape[:-1]
        n = 1
        for s in lead_shape:
            n *= int(s)

        # Feature-major (lane-dense) view: features on sublanes, points on lanes.
        x_t = x.reshape(n, d_input).T                      # (d_input, n)

        tile_n = _choose_tile_n(n, tile_n_max)
        grid = (pl.cdiv(n, tile_n),)                       # ragged tail clipped by Pallas

        itemsize = jnp.dtype(x.dtype).itemsize
        blk_bytes = (d_input + d_output) * tile_n * itemsize
        vmem_limit = int(min(96 * 2**20, max(32 * 2**20, 4 * blk_bytes)))

        out_t = pl.pallas_call(
            kernel,
            out_shape=jax.ShapeDtypeStruct((d_output, n), x.dtype),
            grid=grid,
            in_specs=[pl.BlockSpec((d_input, tile_n), lambda i: (0, i))],
            out_specs=pl.BlockSpec((d_output, tile_n), lambda i: (0, i)),
            compiler_params=pltpu.CompilerParams(
                dimension_semantics=("parallel",),
                vmem_limit_bytes=vmem_limit),
        )(x_t)

        # Back to the module's [..., d_output] layout (cheap XLA transpose).
        return out_t.T.reshape(*lead_shape, d_output)

    return apply, d_output


def _reference(x, d_input, n_freqs, log_space=False):
    """Pure-JAX mirror of the PyTorch forward for verification."""
    parts = [x]
    for f in _freq_bands(n_freqs, log_space):
        parts.append(jnp.sin(x * float(f)))
        parts.append(jnp.cos(x * float(f)))
    return jnp.concatenate(parts, axis=-1)


if __name__ == "__main__":
    key = jax.random.PRNGKey(0)
    k1, k2, k3 = jax.random.split(key, 3)

    # Case 1: 3-D coordinates, linear frequency spacing, tiny N (single block).
    d_in1, n_freqs1 = 3, 4
    enc1, d_out1 = make_positional_encoder(d_in1, n_freqs1, log_space=False)
    x1 = jax.random.normal(k1, (16, d_in1), dtype=jnp.float32)
    o1 = jax.block_until_ready(enc1(x1))
    assert o1.shape == (16, d_out1), o1.shape
    assert jnp.allclose(o1, _reference(x1, d_in1, n_freqs1, False),
                        atol=1e-5, rtol=1e-5), "mismatch vs reference (linear)"

    # Case 2: log-spaced frequencies, N not a multiple of 128.
    d_in2, n_freqs2 = 3, 6
    enc2, d_out2 = make_positional_encoder(d_in2, n_freqs2, log_space=True)
    x2 = jax.random.normal(k2, (50, d_in2), dtype=jnp.float32)
    o2 = jax.block_until_ready(enc2(x2))
    assert o2.shape == (50, d_out2), o2.shape
    assert jnp.allclose(o2, _reference(x2, d_in2, n_freqs2, True),
                        atol=1e-5, rtol=1e-5), "mismatch vs reference (log)"

    # Case 3: leading batch dims + multi-step grid with a ragged last block.
    d_in3, n_freqs3 = 3, 5
    enc3, d_out3 = make_positional_encoder(d_in3, n_freqs3, log_space=True)
    x3 = jax.random.normal(k3, (2, 650, d_in3), dtype=jnp.float32)
    o3 = jax.block_until_ready(enc3(x3))
    assert o3.shape == (2, 650, d_out3), o3.shape
    assert jnp.allclose(o3, _reference(x3, d_in3, n_freqs3, True),
                        atol=1e-5, rtol=1e-5), "mismatch vs reference (batched/ragged)"

    print("KERNEL_OK")
</pallas_src>

<mosaic_0001>
module attributes {stable_mosaic.version = 11 : i64} {
  func.func @_posenc_kernel(%arg0: i32, %arg1: memref<3x16xf32, #tpu.memory_space<vmem>>, %arg2: memref<27x16xf32, #tpu.memory_space<vmem>>) attributes {dimension_semantics = [#tpu.dimension_semantics<parallel>], iteration_bounds = array<i64: 1>, scalar_prefetch = 0 : i64, scratch_operands = 0 : i64, tpu.core_type = #tpu.core_type<tc>, window_params = [{transform_indices = @transform_0, window_bounds = array<i64: 3, 16>}, {transform_indices = @transform_1, window_bounds = array<i64: 27, 16>}]} {
    %c0 = arith.constant 0 : index
    %c0_0 = arith.constant 0 : index
    %0 = vector.load %arg1[%c0, %c0_0] : memref<3x16xf32, #tpu.memory_space<vmem>>, vector<3x16xf32>
    %c0_1 = arith.constant 0 : index
    %c0_2 = arith.constant 0 : index
    %1 = vector.load %arg2[%c0_1, %c0_2] : memref<27x16xf32, #tpu.memory_space<vmem>>, vector<3x16xf32>
    tpu.vector_store %arg2[%c0_1, %c0_2], %0 {strides = array<i32>} : memref<27x16xf32, #tpu.memory_space<vmem>>, vector<3x16xf32>,
    %cst = arith.constant 1.000000e+00 : f32
    %2 = vector.broadcast %cst : f32 to vector<3x16xf32>
    %3 = arith.mulf %0, %2 : vector<3x16xf32>
    %4 = math.sin %3 : vector<3x16xf32>
    %c3 = arith.constant 3 : index
    %c0_3 = arith.constant 0 : index
    %5 = vector.load %arg2[%c3, %c0_3] : memref<27x16xf32, #tpu.memory_space<vmem>>, vector<3x16xf32>
    tpu.vector_store %arg2[%c3, %c0_3], %4 {strides = array<i32>} : memref<27x16xf32, #tpu.memory_space<vmem>>, vector<3x16xf32>,
    %6 = math.cos %3 : vector<3x16xf32>
    %c6 = arith.constant 6 : index
    %c0_4 = arith.constant 0 : index
    %7 = vector.load %arg2[%c6, %c0_4] : memref<27x16xf32, #tpu.memory_space<vmem>>, vector<3x16xf32>
    tpu.vector_store %arg2[%c6, %c0_4], %6 {strides = array<i32>} : memref<27x16xf32, #tpu.memory_space<vmem>>, vector<3x16xf32>,
    %cst_5 = arith.constant 3.33333325 : f32
    %8 = vector.broadcast %cst_5 : f32 to vector<3x16xf32>
    %9 = arith.mulf %0, %8 : vector<3x16xf32>
    %10 = math.sin %9 : vector<3x16xf32>
    %c9 = arith.constant 9 : index
    %c0_6 = arith.constant 0 : index
    %11 = vector.load %arg2[%c9, %c0_6] : memref<27x16xf32, #tpu.memory_space<vmem>>, vector<3x16xf32>
    tpu.vector_store %arg2[%c9, %c0_6], %10 {strides = array<i32>} : memref<27x16xf32, #tpu.memory_space<vmem>>, vector<3x16xf32>,
    %12 = math.cos %9 : vector<3x16xf32>
    %c12 = arith.constant 12 : index
    %c0_7 = arith.constant 0 : index
    %13 = vector.load %arg2[%c12, %c0_7] : memref<27x16xf32, #tpu.memory_space<vmem>>, vector<3x16xf32>
    tpu.vector_store %arg2[%c12, %c0_7], %12 {strides = array<i32>} : memref<27x16xf32, #tpu.memory_space<vmem>>, vector<3x16xf32>,
    %cst_8 = arith.constant 5.66666651 : f32
    %14 = vector.broadcast %cst_8 : f32 to vector<3x16xf32>
    %15 = arith.mulf %0, %14 : vector<3x16xf32>
    %16 = math.sin %15 : vector<3x16xf32>
    %c15 = arith.constant 15 : index
    %c0_9 = arith.constant 0 : index
    %17 = vector.load %arg2[%c15, %c0_9] : memref<27x16xf32, #tpu.memory_space<vmem>>, vector<3x16xf32>
    tpu.vector_store %arg2[%c15, %c0_9], %16 {strides = array<i32>} : memref<27x16xf32, #tpu.memory_space<vmem>>, vector<3x16xf32>,
    %18 = math.cos %15 : vector<3x16xf32>
    %c18 = arith.constant 18 : index
    %c0_10 = arith.constant 0 : index
    %19 = vector.load %arg2[%c18, %c0_10] : memref<27x16xf32, #tpu.memory_space<vmem>>, vector<3x16xf32>
    tpu.vector_store %arg2[%c18, %c0_10], %18 {strides = array<i32>} : memref<27x16xf32, #tpu.memory_space<vmem>>, vector<3x16xf32>,
    %cst_11 = arith.constant 8.000000e+00 : f32
    %20 = vector.broadcast %cst_11 : f32 to vector<3x16xf32>
    %21 = arith.mulf %0, %20 : vector<3x16xf32>
    %22 = math.sin %21 : vector<3x16xf32>
    %c21 = arith.constant 21 : index
    %c0_12 = arith.constant 0 : index
    %23 = vector.load %arg2[%c21, %c0_12] : memref<27x16xf32, #tpu.memory_space<vmem>>, vector<3x16xf32>
    tpu.vector_store %arg2[%c21, %c0_12], %22 {strides = array<i32>} : memref<27x16xf32, #tpu.memory_space<vmem>>, vector<3x16xf32>,
    %24 = math.cos %21 : vector<3x16xf32>
    %c24 = arith.constant 24 : index
    %c0_13 = arith.constant 0 : index
    %25 = vector.load %arg2[%c24, %c0_13] : memref<27x16xf32, #tpu.memory_space<vmem>>, vector<3x16xf32>
    tpu.vector_store %arg2[%c24, %c0_13], %24 {strides = array<i32>} : memref<27x16xf32, #tpu.memory_space<vmem>>, vector<3x16xf32>,
    return
  }
  func.func @transform_0(%arg0: i32) -> (i32, i32) {
    %c0_i32 = arith.constant 0 : i32
    %c0_i32_0 = arith.constant 0 : i32
    return %c0_i32, %arg0 : i32, i32
  }
  func.func @transform_1(%arg0: i32) -> (i32, i32) {
    %c0_i32 = arith.constant 0 : i32
    %c0_i32_0 = arith.constant 0 : i32
    return %c0_i32, %arg0 : i32, i32
  }
}

</mosaic_0001>

<bundles_post_ra>
// kernel: tpu_custom_call.1
= control target key start
LH: loop header
LB: loop body
LE: loop exit
PB: predicated region body
PF: predicated region fallthrough
CT: control target
= control target key end

     0   :  { %6 = vsyncpa [#allocation3], 0  ;;  %s960_s6 = smov [#allocation2]   ;;  %s1321_s0 = inlined_call_operand.hbm [shape: f32[3,16], index: 0, kind: input, shape index: {}]   ;;  %s1322_s1 = inlined_call_operand.vmem [shape: f32[27,16], index: 1, kind: output, shape index: {}]  }
   0x1   :  { %s13_s7 = sshll.u32 %s960_s6, 4  ;;  %s14_s7 = int_to_ptr.vmem [resolvable:$true] %s13_s7 }
   0x2   :  { %s946_s8 = scalar_lea.vmem %s14_s7, 64  ;;  %p951_p1 = scmp.lt.s32.totalorder %s14_s7, %s14_s7 }
   0x3   :  { %p947_p0 = scmp.ne.s32.totalorder %s14_s7, %s946_s8  ;;  %p952_p2 = scmp.lt.s32.totalorder %s946_s8, %s946_s8 }
   0x5   :  { %p953_p3 = por %p952_p2, %p951_p1 }
   0x7   :  { %p954_p4 = pnand %p953_p3, %p947_p0 }
   0x9   :  { %957 = shalt.err (!%p954_p4)
}
   0xa   :  { %16 = dma.hbm_to_vmem [thread:$0]  %s1321_s0, 64, %s14_s7, [#allocation3]  }
   0xb   :  { %958 = dma.done.wait [#allocation3], 64  }
   0xc   :  { %959 = vsyncadd [#allocation3], 4294967232  ;;  %vm21_vm0 = vcmask 124928   ;;  %v980_v0 = vld [vmem:[#allocation2] sm:$0x7] }
   0xd   :  { %22 = vst.msk [vmem:[%s1322_s1] sm:$0x7] %vm21_vm0, %v980_v0  ;;  %v23_v1 = vand.u32 2147483647, %v980_v0  ;;  %v26_v2 = vand.u32 2139095040, %v980_v0  ;;  %vm25_vm14 = vcmp.lt.s32.totalorder %v980_v0, 0 }
   0xe   :  { %v990_v3 = vmul.f32 3.3333333, %v980_v0  ;;  %v993_v4 = vmul.f32 5.6666665, %v980_v0  ;;  %v961_v26 = vmov 683565275  }
   0xf   :  { %v27_v5 = vshrl.u32 %v26_v2, 23  ;;  %v30_v6 = vand.u32 8388607, %v23_v1  ;;  %v962_v28 = vmov 2475754826  }
  0x10   :  { %v233_v7 = vand.u32 2147483647, %v990_v3  ;;  %v236_v8 = vand.u32 2139095040, %v990_v3  ;;  %v446_v12 = vand.u32 2139095040, %v993_v4  ;;  %v963_v30 = vmov 2131351028  }
  0x11   :  { %v867_v9 = vadd.s32 4294967169, %v27_v5  ;;  %v31_v14 = vor.u32 8388608, %v30_v6  ;;  %v964_v32 = vmov 2102212464   ;;  %v965_v34 = vmov 920167782  }
  0x12   :  { %v237_v10 = vshrl.u32 %v236_v8, 23  ;;  %v240_v11 = vand.u32 8388607, %v233_v7  ;;  %v447_v17 = vshrl.u32 %v446_v12, 23  ;;  %v966_v41 = vmov 1326507024  }
  0x13   :  { %v33_v13 = vadd.s32 1, %v867_v9  ;;  %v1002_v22 = vshll.u32 %v31_v14, 8  ;;  %vm1102_vm15 = vcmp.le.f32.partialorder %v23_v1, 0.7853982 }
  0x14   :  { %v875_v15 = vadd.s32 4294967169, %v237_v10  ;;  %v241_v16 = vor.u32 8388608, %v240_v11  ;;  %v1006_v24 = vadd.s32 4294967169, %v447_v17 }
  0x15   :  { %vm34_vm1 = vcmp.gt.s32.totalorder %v33_v13, 0 }
  0x16   :  { %v35_v18 = vsel %vm34_vm1, %v33_v13, 0  ;;  %v243_v19 = vadd.s32 1, %v875_v15  ;;  %v1004_v23 = vshll.u32 %v241_v16, 8 }
  0x17   :  { %v36_v20 = vshrl.u32 %v35_v18, 5  ;;  %v37_v21 = vand.u32 31, %v35_v18 }
  0x18   :  { %vm244_vm2 = vcmp.gt.s32.totalorder %v243_v19, 0 }
  0x19   :  { %v38_v25 = vsub.s32 32, %v37_v21  ;;  %v40_v27 = vshll.u32 %v961_v26, %v37_v21  ;;  %v43_v29 = vshll.u32 %v962_v28, %v37_v21  ;;  %v46_v31 = vshll.u32 %v963_v30, %v37_v21 }
  0x1a   :  { %v49_v33 = vshll.u32 %v964_v32, %v37_v21  ;;  %v52_v35 = vshll.u32 %v965_v34, %v37_v21  ;;  %vm55_vm3 = vcmp.lt.s32.totalorder %v36_v20, 1  ;;  %vm56_vm4 = vcmp.lt.s32.totalorder %v36_v20, 2 }
  0x1b   :  { %v39_v36 = vshrl.u32 %v961_v26, %v38_v25  ;;  %v41_v37 = vshrl.u32 %v962_v28, %v38_v25  ;;  %v44_v38 = vshrl.u32 %v963_v30, %v38_v25  ;;  %v47_v39 = vshrl.u32 %v964_v32, %v38_v25 }
  0x1c   :  { %v50_v40 = vshrl.u32 %v965_v34, %v38_v25  ;;  %v53_v42 = vshrl.u32 %v966_v41, %v38_v25  ;;  %vm57_vm5 = vcmp.lt.s32.totalorder %v36_v20, 3  ;;  %vm58_vm6 = vcmp.lt.s32.totalorder %v36_v20, 4 }
  0x1d   :  { %v42_v43 = vor.u32 %v41_v37, %v40_v27  ;;  %v45_v44 = vor.u32 %v44_v38, %v43_v29  ;;  %v48_v45 = vor.u32 %v47_v39, %v46_v31  ;;  %v245_v46 = vsel %vm244_vm2, %v243_v19, 0 }
  0x1e   :  { %v51_v47 = vor.u32 %v50_v40, %v49_v33  ;;  %v54_v48 = vor.u32 %v53_v42, %v52_v35  ;;  %v246_v49 = vshrl.u32 %v245_v46, 5  ;;  %v247_v50 = vand.u32 31, %v245_v46 }
  0x1f   :  { %v59_v51 = vsel %vm55_vm3, %v39_v36, %v42_v43  ;;  %v60_v52 = vsel %vm58_vm6, %v48_v45, 2102212464  ;;  %v63_v53 = vsel %vm55_vm3, %v42_v43, %v45_v44  ;;  %v67_v54 = vsel %vm55_vm3, %v45_v44, %v48_v45 }
  0x20   :  { %v61_v55 = vsel %vm57_vm5, %v45_v44, %v60_v52  ;;  %v64_v56 = vsel %vm58_vm6, %v51_v47, 920167782  ;;  %v68_v57 = vsel %vm58_vm6, %v54_v48, 1326507024  ;;  %v248_v58 = vsub.s32 32, %v247_v50 }
  0x21   :  { %v62_v59 = vsel %vm56_vm4, %v59_v51, %v61_v55  ;;  %v65_v60 = vsel %vm57_vm5, %v48_v45, %v64_v56  ;;  %v69_v61 = vsel %vm57_vm5, %v51_v47, %v68_v57  ;;  %v250_v62 = vshll.u32 %v961_v26, %v247_v50 }
  0x22   :  { %v66_v63 = vsel %vm56_vm4, %v63_v53, %v65_v60  ;;  %v70_v2 = vsel %vm56_vm4, %v67_v54, %v69_v61  ;;  %v78_v5 = vmul.u32 %v1002_v22, %v62_v59  ;;  %v249_v6 = vshrl.u32 %v961_v26, %v248_v58 }
  0x23   :  { %v1033_v8 = vmul.u32.u64.low %v1002_v22, %v70_v2  ;;  %v1034_v9 = vmul.u32.u64.high %v1002_v22, %v70_v2, %v1033_v8  ;;  %v1037_v10 = vmul.u32.u64.low %v1002_v22, %v66_v63  ;;  %v1038_v11 = vmul.u32.u64.high %v1002_v22, %v66_v63, %v1037_v10 }
  0x24   :  { %v251_v12 = vshrl.u32 %v962_v28, %v248_v58  ;;  %v253_v13 = vshll.u32 %v962_v28, %v247_v50  ;;  %v254_v14 = vshrl.u32 %v963_v30, %v248_v58  ;;  %v256_v15 = vshll.u32 %v963_v30, %v247_v50 }
  0x25   :  { %v257_v16 = vshrl.u32 %v964_v32, %v248_v58  ;;  %v259_v17 = vshll.u32 %v964_v32, %v247_v50  ;;  %v260_v18 = vshrl.u32 %v965_v34, %v248_v58  ;;  %v262_v19 = vshll.u32 %v965_v34, %v247_v50 }
  0x26   :  { %v252_v20 = vor.u32 %v251_v12, %v250_v62  ;;  %v255_v21 = vor.u32 %v254_v14, %v253_v13  ;;  %v263_v22 = vshrl.u32 %v966_v41, %v248_v58  ;;  %vm265_vm7 = vcmp.lt.s32.totalorder %v246_v49, 1 }
  0x27   :  { %vm80_vm8 = vc.u32 %v1034_v9, %v1037_v10  ;;  %v81_v25 = vadd.s32 1, %v1038_v11  ;;  %v258_v27 = vor.u32 %v257_v16, %v256_v15  ;;  %v453_v29 = vadd.s32 1, %v1006_v24 }
  0x28   :  { %v261_v31 = vor.u32 %v260_v18, %v259_v17  ;;  %v264_v33 = vor.u32 %v263_v22, %v262_v19  ;;  %vm266_vm9 = vcmp.lt.s32.totalorder %v246_v49, 2  ;;  %vm267_vm10 = vcmp.lt.s32.totalorder %v246_v49, 3 }
  0x29   :  { %v82_v35 = vsel %vm80_vm8, %v81_v25, %v1038_v11  ;;  %vm268_vm11 = vcmp.lt.s32.totalorder %v246_v49, 4  ;;  %v269_v36 = vsel %vm265_vm7, %v249_v6, %v252_v20  ;;  %v273_v37 = vsel %vm265_vm7, %v252_v20, %v255_v21 }
  0x2a   :  { %v83_v38 = vadd.s32 %v82_v35, %v78_v5  ;;  %v270_v39 = vsel %vm268_vm11, %v258_v27, 2102212464  ;;  %v274_v40 = vsel %vm268_vm11, %v261_v31, 920167782  ;;  %v277_v42 = vsel %vm265_vm7, %v255_v21, %v258_v27 }
  0x2b   :  { %v271_v43 = vsel %vm267_vm10, %v255_v21, %v270_v39  ;;  %v275_v44 = vsel %vm267_vm10, %v258_v27, %v274_v40  ;;  %v278_v45 = vsel %vm268_vm11, %v264_v33, 1326507024  ;;  %vm454_vm12 = vcmp.gt.s32.totalorder %v453_v29, 0 }
  0x2c   :  { %v84_v24 = vadd.s32 536870912, %v83_v38  ;;  %v276_v46 = vsel %vm266_vm9, %v273_v37, %v275_v44  ;;  %v279_v47 = vsel %vm267_vm10, %v261_v31, %v278_v45  ;;  %v443_v48 = vand.u32 2147483647, %v993_v4 }
  0x2d   :  { %v272_v50 = vsel %vm266_vm9, %v269_v36, %v271_v43  ;;  %v280_v51 = vsel %vm266_vm9, %v277_v42, %v279_v47  ;;  %v1063_v52 = vmul.u32.u64.low %v1004_v23, %v276_v46  ;;  %v1064_v53 = vmul.u32.u64.high %v1004_v23, %v276_v46, %v1063_v52 }
  0x2e   :  { %v85_v54 = vshrl.u32 %v84_v24, 30  ;;  %v1068_v55 = vmul.u32.u64.low %v1004_v23, %v280_v51  ;;  %v1069_v56 = vmul.u32.u64.high %v1004_v23, %v280_v51, %v1068_v55  ;;  %v455_v57 = vsel %vm454_vm12, %v453_v29, 0 }
  0x2f   :  { %v457_v58 = vand.u32 31, %v455_v57  ;;  %v288_v60 = vmul.u32 %v1004_v23, %v272_v50  ;;  %v1073_v61 = vmul.f32 8.0, %v980_v0  ;;  %v291_v49 = vadd.s32 1, %v1064_v53 }
  0x30   :  { %v86_v59 = vshll.u32 %v85_v54, 30  ;;  %v450_v62 = vand.u32 8388607, %v443_v48  ;;  %vm290_vm13 = vc.u32 %v1069_v56, %v1063_v52  ;;  %v109_v13 = vsub.s32 4, %v85_v54 }
  0x31   :  { %v653_v2 = vand.u32 2147483647, %v1073_v61  ;;  %v292_v5 = vsel %vm290_vm13, %v291_v49, %v1064_v53  ;;  %v458_v6 = vsub.s32 32, %v457_v58  ;;  %v656_v14 = vand.u32 2139095040, %v1073_v61 }
  0x32   :  { %v87_v63 = vsub.s32 %v83_v38, %v86_v59  ;;  %v293_v11 = vadd.s32 %v292_v5, %v288_v60  ;;  %v451_v23 = vor.u32 8388608, %v450_v62  ;;  %v460_v17 = vshll.u32 %v961_v26, %v457_v58 }
  0x33   :  { %v1085_v15 = vand.u32 8388607, %v653_v2  ;;  %v461_v18 = vshrl.u32 %v962_v28, %v458_v6  ;;  %v463_v19 = vshll.u32 %v962_v28, %v457_v58  ;;  %v464_v21 = vshrl.u32 %v963_v30, %v458_v6 }
  0x34   :  { %v89_v8 = vsub.s32 0, %v87_v63  ;;  %v294_v16 = vadd.s32 536870912, %v293_v11  ;;  %v466_v22 = vshll.u32 %v963_v30, %v457_v58  ;;  %v467_v25 = vshrl.u32 %v964_v32, %v458_v6 }
  0x35   :  { %v79_v27 = vadd.s32 %v1037_v10, %v1034_v9  ;;  %v1098_v31 = vshll.u32 %v451_v23, 8  ;;  %v456_v36 = vshrl.u32 %v455_v57, 5  ;;  %v469_v37 = vshll.u32 %v964_v32, %v457_v58 }
  0x36   :  { %v868_v12 = vmin.u32 %v89_v8, %v87_v63  ;;  %v1096_v29 = vshrl.u32 %v294_v16, 30  ;;  %v470_v38 = vshrl.u32 %v965_v34, %v458_v6  ;;  %v110_v39 = vsel %vm25_vm14, %v109_v13, %v85_v54 }
  0x37   :  { %v657_v10 = vshrl.u32 %v656_v14, 23  ;;  %v661_v40 = vor.u32 8388608, %v1085_v15  ;;  %v462_v42 = vor.u32 %v461_v18, %v460_v17  ;;  %v465_v1 = vor.u32 %v464_v21, %v463_v19 }
  0x38   :  { %v91_v20 = vclz %v868_v12  ;;  %v296_v9 = vshll.u32 %v1096_v29, 30  ;;  %v468_v43 = vor.u32 %v467_v25, %v466_v22  ;;  %v472_v24 = vshll.u32 %v965_v34, %v457_v58 }
  0x39   :  { %v473_v46 = vshrl.u32 %v966_v41, %v458_v6  ;;  %v471_v53 = vor.u32 %v470_v38, %v469_v37  ;;  %v459_v55 = vshrl.u32 %v961_v26, %v458_v6  ;;  %vm475_vm2 = vcmp.lt.s32.totalorder %v456_v36, 1 }
  0x3a   :  { %v869_v35 = vadd.s32 4294967294, %v91_v20  ;;  %v1112_v45 = vsub.s32 %v293_v11, %v296_v9  ;;  %vm478_vm3 = vcmp.lt.s32.totalorder %v456_v36, 4  ;;  %v289_v60 = vadd.s32 %v1063_v52, %v1069_v56 }
  0x3b   :  { %v480_v49 = vsel %vm478_vm3, %v468_v43, 2102212464  ;;  %v474_v62 = vor.u32 %v473_v46, %v472_v24  ;;  %vm476_vm4 = vcmp.lt.s32.totalorder %v456_v36, 2  ;;  %vm477_vm5 = vcmp.lt.s32.totalorder %v456_v36, 3 }
  0x3c   :  { %vm870_vm1 = vcmp.lt.s32.totalorder %v869_v35, 0  ;;  %v299_v54 = vsub.s32 0, %v1112_v45  ;;  %v483_v8 = vsel %vm475_vm2, %v462_v42, %v465_v1  ;;  %v484_v6 = vsel %vm478_vm3, %v471_v53, 920167782 }
  0x3d   :  { %v94_v44 = vsel %vm870_vm1, 0, %v869_v35  ;;  %v112_v11 = vsel %vm1102_vm15, 0, %v110_v39  ;;  %vm235_vm6 = vcmp.lt.s32.totalorder %v990_v3, 0  ;;  %v479_v52 = vsel %vm475_vm2, %v459_v55, %v462_v42 }
  0x3e   :  { %v95_v47 = vsub.s32 32, %v94_v44  ;;  %v96_v50 = vshll.u32 %v87_v63, %v94_v44  ;;  %v99_v51 = vsub.s32 4294967266, %v94_v44  ;;  %v876_v58 = vmin.u32 %v299_v54, %v1112_v45 }
  0x3f   :  { %v481_v56 = vsel %vm477_vm5, %v465_v1, %v480_v49  ;;  %v485_v14 = vsel %vm477_vm5, %v468_v43, %v484_v6  ;;  %v487_v16 = vsel %vm475_vm2, %v465_v1, %v468_v43  ;;  %v319_v18 = vsub.s32 4, %v1096_v29 }
  0x40   :  { %v97_v57 = vshrl.u32 %v79_v27, %v95_v47  ;;  %v100_v59 = vadd.s32 127, %v99_v51  ;;  %v301_v23 = vclz %v876_v58  ;;  %v486_v19 = vsel %vm476_vm4, %v483_v8, %v485_v14 }
  0x41   :  { %v488_v20 = vsel %vm478_vm3, %v474_v62, 1326507024  ;;  %vm1136_vm7 = vcmp.le.f32.partialorder %v233_v7, 0.7853982  ;;  %v1142_v27 = vmul.u32.u64.low %v1098_v31, %v486_v19  ;;  %v1143_v35 = vmul.u32.u64.high %v1098_v31, %v486_v19, %v1142_v27 }
  0x42   :  { %v98_v63 = vor.u32 %v97_v57, %v96_v50  ;;  %v101_v5 = vshll.u32 %v100_v59, 23  ;;  %v877_v17 = vadd.s32 4294967294, %v301_v23  ;;  %v489_v25 = vsel %vm477_vm5, %v471_v53, %v488_v20 }
  0x43   :  { %v482_v37 = vsel %vm476_vm4, %v479_v52, %v481_v56  ;;  %v490_v38 = vsel %vm476_vm4, %v487_v16, %v489_v25  ;;  %v891_v39 = vadd.s32 4294967169, %v657_v10  ;;  %v116_v50 = vadd.s32 3, %v112_v11 }
  0x44   :  { %v102_v12 = vor.u32 4788187, %v101_v5  ;;  %v105_v13 = vcvt.s32.f32 %v98_v63  ;;  %vm878_vm8 = vcmp.lt.s32.totalorder %v877_v17, 0  ;;  %v498_v51 = vmul.u32 %v1098_v31, %v482_v37 }
  0x45   :  { %v304_v42 = vsel %vm878_vm8, 0, %v877_v17  ;;  %v1149_v7 = vmul.u32.u64.low %v1098_v31, %v490_v38  ;;  %v1150_v1 = vmul.u32.u64.high %v1098_v31, %v490_v38, %v1149_v7  ;;  %v663_v46 = vadd.s32 1, %v891_v39 }
  0x46   :  { %v103_v21 = vand.u32 2147483647, %v102_v12  ;;  %v305_v43 = vsub.s32 32, %v304_v42  ;;  %v306_v44 = vshll.u32 %v1112_v45, %v304_v42  ;;  %v309_v24 = vsub.s32 4294967266, %v304_v42 }
  0x47   :  { %v501_v53 = vadd.s32 1, %v1143_v35  ;;  %v1155_v36 = vand.u32 3, %v112_v11  ;;  %vm664_vm9 = vcmp.gt.s32.totalorder %v663_v46, 0  ;;  %v320_v45 = vsel %vm235_vm6, %v319_v18, %v1096_v29 }
  0x48   :  { %v106_v9 = vmul.f32 %v105_v13, %v103_v21  ;;  %v307_v10 = vshrl.u32 %v289_v60, %v305_v43  ;;  %v310_v54 = vadd.s32 127, %v309_v24  ;;  %vm500_vm10 = vc.u32 %v1150_v1, %v1142_v27 }
  0x49   :  { %v665_v57 = vsel %vm664_vm9, %v663_v46, 0  ;;  %v502_v60 = vsel %vm500_vm10, %v501_v53, %v1143_v35  ;;  %v1168_v58 = vand.u32 3, %v116_v50  ;;  %v322_v8 = vsel %vm1136_vm7, 0, %v320_v45 }
  0x4a   :  { %v107_v47 = vxor.u32 2147483648, %v106_v9  ;;  %v308_v59 = vor.u32 %v307_v10, %v306_v44  ;;  %v311_v49 = vshll.u32 %v310_v54, 23  ;;  %v503_v62 = vadd.s32 %v502_v60, %v498_v51 }
  0x4b   :  { %v667_v63 = vand.u32 31, %v665_v57  ;;  %v1179_v16 = vshrl.u32 %v665_v57, 5  ;;  %vm115_vm11 = vweird.f32 %v980_v0  ;;  %vm222_vm12 = vcmp.lt.s32.totalorder %v1155_v36, 2 }
  0x4c   :  { %v108_v55 = vsel %vm25_vm14, %v107_v47, %v106_v9  ;;  %v312_v5 = vor.u32 4788187, %v311_v49  ;;  %v315_v29 = vcvt.s32.f32 %v308_v59  ;;  %v504_v6 = vadd.s32 536870912, %v503_v62 }
  0x4d   :  { %v111_v31 = vsel %vm1102_vm15, %v980_v0, %v108_v55  ;;  %v668_v11 = vsub.s32 32, %v667_v63  ;;  %v670_v33 = vshll.u32 %v961_v26, %v667_v63  ;;  %v673_v23 = vshll.u32 %v962_v28, %v667_v63 }
  0x4e   :  { %922 = vcosq.f32 %v111_v31  ;;  %v313_v52 = vand.u32 2147483647, %v312_v5  ;;  %v676_v56 = vshll.u32 %v963_v30, %v667_v63  ;;  %v679_v12 = vshll.u32 %v964_v32, %v667_v63 }
  0x4f   :  { %924 = vsinq.f32 %v111_v31  ;;  %v682_v13 = vshll.u32 %v965_v34, %v667_v63  ;;  %v1177_v14 = vshrl.u32 %v504_v6, 30  ;;  %v671_v17 = vshrl.u32 %v962_v28, %v668_v11 }
  0x50   :  { %v674_v18 = vshrl.u32 %v963_v30, %v668_v11  ;;  %v316_v19 = vmul.f32 %v315_v29, %v313_v52  ;;  %v677_v20 = vshrl.u32 %v964_v32, %v668_v11  ;;  %v680_v21 = vshrl.u32 %v965_v34, %v668_v11 }
  0x51   :  { %v683_v25 = vshrl.u32 %v966_v41, %v668_v11  ;;  %v506_v35 = vshll.u32 %v1177_v14, 30  ;;  %v669_v37 = vshrl.u32 %v961_v26, %v668_v11  ;;  %v672_v38 = vor.u32 %v671_v17, %v670_v33 }
  0x52   :  { %v675_v39 = vor.u32 %v674_v18, %v673_v23  ;;  %v317_v9 = vxor.u32 2147483648, %v316_v19  ;;  %v678_v42 = vor.u32 %v677_v20, %v676_v56  ;;  %v681_v7 = vor.u32 %v680_v21, %v679_v12 }
  0x53   :  { %v684_v43 = vor.u32 %v683_v25, %v682_v13  ;;  %vm223_vm13 = vcmp.eq.s32.totalorder %v1155_v36, 0  ;;  %v1191_v28 = vsub.s32 %v503_v62, %v506_v35  ;;  %vm685_vm14 = vcmp.lt.s32.totalorder %v1179_v16, 1 }
  0x54   :  { %vm118_vm15 = vcmp.lt.s32.totalorder %v1168_v58, 2  ;;  %vm119_vm1 = vcmp.eq.s32.totalorder %v1168_v58, 0  ;;  %vm226_vm2 = vcmp.eq.s32.totalorder %v1155_v36, 2  ;;  %v318_v26 = vsel %vm235_vm6, %v317_v9, %v316_v19 }
  0x55   :  { %v321_v30 = vsel %vm1136_vm7, %v990_v3, %v318_v26  ;;  %v326_v32 = vadd.s32 3, %v322_v8  ;;  %v509_v34 = vsub.s32 0, %v1191_v28  ;;  %vm688_vm3 = vcmp.lt.s32.totalorder %v1179_v16, 4 }
  0x56   :  { %926 = vcosq.f32 %v321_v30  ;;  %v689_v41 = vsel %vm685_vm14, %v669_v37, %v672_v38  ;;  %v690_v44 = vsel %vm688_vm3, %v678_v42, 2102212464  ;;  %v693_v24 = vsel %vm685_vm14, %v672_v38, %v675_v39 }
  0x57   :  { %vm122_vm4 = vcmp.eq.s32.totalorder %v1168_v58, 2  ;;  %928 = vsinq.f32 %v321_v30  ;;  %v884_v22 = vmin.u32 %v509_v34, %v1191_v28  ;;  %vm687_vm5 = vcmp.lt.s32.totalorder %v1179_v16, 3 }
  0x58   :  { %v1213_v47 = vand.u32 3, %v322_v8  ;;  %vm686_vm6 = vcmp.lt.s32.totalorder %v1179_v16, 2  ;;  %v691_v50 = vsel %vm687_vm5, %v675_v39, %v690_v44  ;;  %v694_v51 = vsel %vm688_vm3, %v681_v7, 920167782 }
  0x59   :  { %v327_v54 = vand.u32 3, %v326_v32  ;;  %v511_v55 = vclz %v884_v22  ;;  %v701_v45 = vshll.u32 %v661_v40, 8  ;;  %v499_v31 = vadd.s32 %v1142_v27, %v1150_v1 }
  0x5a   :  { %v692_v59 = vsel %vm686_vm6, %v689_v41, %v691_v50  ;;  %v695_v49 = vsel %vm687_vm5, %v678_v42, %v694_v51  ;;  %v697_v1 = vsel %vm685_vm14, %v675_v39, %v678_v42  ;;  %v698_v5 = vsel %vm688_vm3, %v684_v43, 1326507024 }
  0x5b   :  { %v923_v46 = vpop.eup %922  ;;  %v885_v63 = vadd.s32 4294967294, %v511_v55  ;;  %v696_v15 = vsel %vm686_vm6, %v693_v24, %v695_v49  ;;  %v699_v6 = vsel %vm687_vm5, %v681_v7, %v698_v5  ;;  %vm329_vm8 = vcmp.eq.s32.totalorder %v327_v54, 0 }
  0x5c   :  { %v925_v53 = vpop.eup %924  ;;  %v123_v10 = vxor.u32 2147483648, %v923_v46  ;;  %v700_v52 = vsel %vm686_vm6, %v697_v1, %v699_v6  ;;  %v1266_v13 = vmul.u32.u64.low %v701_v45, %v696_v15  ;;  %v1267_v16 = vmul.u32.u64.high %v701_v45, %v696_v15, %v1266_v13 }
  0x5d   :  { %v120_v57 = vxor.u32 2147483648, %v925_v53  ;;  %vm886_vm7 = vcmp.lt.s32.totalorder %v885_v63, 0  ;;  %v1263_v0 = vmul.u32.u64.low %v701_v45, %v700_v52  ;;  %v1264_v12 = vmul.u32.u64.high %v701_v45, %v700_v52, %v1263_v0 }
  0x5e   :  { %v124_v60 = vsel %vm122_vm4, %v123_v10, %v925_v53  ;;  %v228_v62 = vsel %vm226_vm2, %v123_v10, %v925_v53  ;;  %v514_v23 = vsel %vm886_vm7, 0, %v885_v63  ;;  %vm432_vm9 = vcmp.lt.s32.totalorder %v1213_v47, 2 }
  0x5f   :  { %v121_v40 = vsel %vm119_vm1, %v923_v46, %v120_v57  ;;  %v225_v27 = vsel %vm223_vm13, %v923_v46, %v120_v57  ;;  %v515_v36 = vsub.s32 32, %v514_v23  ;;  %v516_v58 = vshll.u32 %v1191_v28, %v514_v23 }
  0x60   :  { %v125_v29 = vsel %vm118_vm15, %v121_v40, %v124_v60  ;;  %v229_v8 = vsel %vm222_vm12, %v225_v27, %v228_v62  ;;  %v519_v56 = vsub.s32 4294967266, %v514_v23  ;;  %vm433_vm10 = vcmp.eq.s32.totalorder %v1213_v47, 0 }
  0x61   :  { %v126_v11 = vsel %vm115_vm11, nan, %v125_v29  ;;  %v230_v33 = vsel %vm115_vm11, nan, %v229_v8  ;;  %v517_v17 = vshrl.u32 %v499_v31, %v515_v36  ;;  %vm436_vm11 = vcmp.eq.s32.totalorder %v1213_v47, 2 }
  0x62   :  { %127 = vst.msk [vmem:[%s1322_s1 + $0x3] sm:$0x7] %vm21_vm0, %v126_v11  ;;  %231 = vst.msk [vmem:[%s1322_s1 + $0x6] sm:$0x7] %vm21_vm0, %v230_v33  ;;  %v520_v18 = vadd.s32 127, %v519_v56  ;;  %vm332_vm12 = vcmp.eq.s32.totalorder %v327_v54, 2  ;;  %v708_v25 = vmul.u32 %v701_v45, %v692_v59  ;;  %v709_v38 = vadd.s32 %v1266_v13, %v1264_v12 }
  0x63   :  { %v927_v19 = vpop.eup %926  ;;  %v518_v20 = vor.u32 %v517_v17, %v516_v58  ;;  %vm710_vm13 = vc.u32 %v1264_v12, %v1266_v13  ;;  %v711_v39 = vadd.s32 1, %v1267_v16  ;;  %vm328_vm14 = vcmp.lt.s32.totalorder %v327_v54, 2 }
  0x64   :  { %v521_v21 = vshll.u32 %v520_v18, 23  ;;  %v929_v35 = vpop.eup %928  ;;  %v333_v37 = vxor.u32 2147483648, %v927_v19  ;;  %vm325_vm15 = vweird.f32 %v990_v3  ;;  %vm445_vm1 = vcmp.lt.s32.totalorder %v993_v4, 0 }
  0x65   :  { %v330_v9 = vxor.u32 2147483648, %v929_v35  ;;  %v525_v7 = vcvt.s32.f32 %v518_v20  ;;  %v712_v26 = vsel %vm710_vm13, %v711_v39, %v1267_v16  ;;  %v529_v51 = vsub.s32 4, %v1177_v14 }
  0x66   :  { %v522_v42 = vor.u32 4788187, %v521_v21  ;;  %v334_v43 = vsel %vm332_vm12, %v333_v37, %v929_v35  ;;  %v438_v28 = vsel %vm436_vm11, %v333_v37, %v929_v35  ;;  %v713_v41 = vadd.s32 %v712_v26, %v708_v25 }
  0x67   :  { %v331_v30 = vsel %vm329_vm8, %v927_v19, %v330_v9  ;;  %v435_v32 = vsel %vm433_vm10, %v927_v19, %v330_v9  ;;  %vm444_vm2 = vcmp.le.f32.partialorder %v443_v48, 0.7853982  ;;  %v530_v55 = vsel %vm445_vm1, %v529_v51, %v1177_v14 }
  0x68   :  { %v523_v34 = vand.u32 2147483647, %v522_v42  ;;  %v335_v44 = vsel %vm328_vm14, %v331_v30, %v334_v43  ;;  %v439_v24 = vsel %vm432_vm9, %v435_v32, %v438_v28  ;;  %v714_v50 = vadd.s32 536870912, %v713_v41 }
  0x69   :  { %v336_v22 = vsel %vm325_vm15, nan, %v335_v44  ;;  %v440_v46 = vsel %vm325_vm15, nan, %v439_v24  ;;  %v532_v31 = vsel %vm444_vm2, 0, %v530_v55  ;;  %vm535_vm8 = vweird.f32 %v993_v4 }
  0x6a   :  { %v526_v3 = vmul.f32 %v525_v7, %v523_v34  ;;  %337 = vst.msk [vmem:[%s1322_s1 + $0x9] sm:$0x7] %vm21_vm0, %v336_v22  ;;  %441 = vst.msk [vmem:[%s1322_s1 + $0xc] sm:$0x7] %vm21_vm0, %v440_v46  ;;  %v715_v53 = vshrl.u32 %v714_v50, 30  ;;  %v536_v60 = vadd.s32 3, %v532_v31 }
  0x6b   :  { %v641_v40 = vand.u32 3, %v532_v31  ;;  %vm655_vm11 = vcmp.lt.s32.totalorder %v1073_v61, 0  ;;  %vm654_vm12 = vcmp.le.f32.partialorder %v653_v2, 0.7853982 }
  0x6c   :  { %v527_v47 = vxor.u32 2147483648, %v526_v3  ;;  %v716_v54 = vshll.u32 %v715_v53, 30  ;;  %v537_v15 = vand.u32 3, %v536_v60  ;;  %v739_v21 = vsub.s32 4, %v715_v53 }
  0x6d   :  { %vm643_vm5 = vcmp.eq.s32.totalorder %v641_v40, 0  ;;  %vm646_vm6 = vcmp.eq.s32.totalorder %v641_v40, 2  ;;  %vm642_vm10 = vcmp.lt.s32.totalorder %v641_v40, 2 }
  0x6e   :  { %v528_v10 = vsel %vm445_vm1, %v527_v47, %v526_v3  ;;  %v717_v57 = vsub.s32 %v713_v41, %v716_v54  ;;  %vm542_vm4 = vcmp.eq.s32.totalorder %v537_v15, 2  ;;  %vm539_vm7 = vcmp.eq.s32.totalorder %v537_v15, 0 }
  0x6f   :  { %v531_v45 = vsel %vm444_vm2, %v993_v4, %v528_v10  ;;  %vm538_vm9 = vcmp.lt.s32.totalorder %v537_v15, 2  ;;  %v740_v37 = vsel %vm655_vm11, %v739_v21, %v715_v53 }
  0x70   :  { %930 = vcosq.f32 %v531_v45  ;;  %v719_v59 = vsub.s32 0, %v717_v57  ;;  %v742_v39 = vsel %vm654_vm12, 0, %v740_v37 }
  0x71   :  { %932 = vsinq.f32 %v531_v45  ;;  %v746_v9 = vadd.s32 3, %v742_v39  ;;  %v851_v7 = vand.u32 3, %v742_v39 }
  0x72   :  { %v892_v49 = vmin.u32 %v719_v59, %v717_v57 }
  0x73   :  { %v747_v42 = vand.u32 3, %v746_v9  ;;  %vm856_vm14 = vcmp.eq.s32.totalorder %v851_v7, 2  ;;  %vm853_vm1 = vcmp.eq.s32.totalorder %v851_v7, 0 }
  0x74   :  { %v721_v62 = vclz %v892_v49 }
  0x75   :  { %vm752_vm13 = vcmp.eq.s32.totalorder %v747_v42, 2  ;;  %vm749_vm15 = vcmp.eq.s32.totalorder %v747_v42, 0  ;;  %vm748_vm2 = vcmp.lt.s32.totalorder %v747_v42, 2 }
  0x76   :  { %v893_v63 = vadd.s32 4294967294, %v721_v62 }
  0x78   :  { %vm894_vm3 = vcmp.lt.s32.totalorder %v893_v63, 0 }
  0x79   :  { %v724_v48 = vsel %vm894_vm3, 0, %v893_v63  ;;  %vm852_vm3 = vcmp.lt.s32.totalorder %v851_v7, 2 }
  0x7a   :  { %v725_v27 = vsub.s32 32, %v724_v48  ;;  %v726_v1 = vshll.u32 %v717_v57, %v724_v48  ;;  %v729_v5 = vsub.s32 4294967266, %v724_v48 }
  0x7c   :  { %v727_v6 = vshrl.u32 %v709_v38, %v725_v27  ;;  %v730_v11 = vadd.s32 127, %v729_v5 }
  0x7d   :  { %v931_v29 = vpop.eup %930 }
  0x7e   :  { %v933_v14 = vpop.eup %932  ;;  %v543_v8 = vxor.u32 2147483648, %v931_v29  ;;  %v728_v36 = vor.u32 %v727_v6, %v726_v1  ;;  %v731_v58 = vshll.u32 %v730_v11, 23 }
  0x7f   :  { %v540_v33 = vxor.u32 2147483648, %v933_v14 }
  0x80   :  { %v544_v23 = vsel %vm542_vm4, %v543_v8, %v933_v14  ;;  %v648_v52 = vsel %vm646_vm6, %v543_v8, %v933_v14  ;;  %v732_v16 = vor.u32 4788187, %v731_v58  ;;  %v735_v17 = vcvt.s32.f32 %v728_v36 }
  0x81   :  { %v541_v56 = vsel %vm539_vm7, %v931_v29, %v540_v33  ;;  %v645_v0 = vsel %vm643_vm5, %v931_v29, %v540_v33  ;;  %vm745_vm4 = vweird.f32 %v1073_v61 }
  0x82   :  { %v545_v12 = vsel %vm538_vm9, %v541_v56, %v544_v23  ;;  %v649_v13 = vsel %vm642_vm10, %v645_v0, %v648_v52  ;;  %v733_v4 = vand.u32 2147483647, %v732_v16 }
  0x83   :  { %v546_v18 = vsel %vm535_vm8, nan, %v545_v12  ;;  %v650_v19 = vsel %vm535_vm8, nan, %v649_v13 }
  0x84   :  { %547 = vst.msk [vmem:[%s1322_s1 + $0xf] sm:$0x7] %vm21_vm0, %v546_v18  ;;  %651 = vst.msk [vmem:[%s1322_s1 + $0x12] sm:$0x7] %vm21_vm0, %v650_v19  ;;  %v736_v20 = vmul.f32 %v735_v17, %v733_v4 }
  0x86   :  { %v737_v25 = vxor.u32 2147483648, %v736_v20 }
  0x88   :  { %v738_v35 = vsel %vm655_vm11, %v737_v25, %v736_v20 }
  0x89   :  { %v741_v38 = vsel %vm654_vm12, %v1073_v61, %v738_v35 }
  0x8a   :  { %934 = vcosq.f32 %v741_v38 }
  0x8b   :  { %936 = vsinq.f32 %v741_v38 }
  0x97   :  { %v935_v43 = vpop.eup %934 }
  0x98   :  { %v937_v28 = vpop.eup %936  ;;  %v753_v26 = vxor.u32 2147483648, %v935_v43 }
  0x99   :  { %v750_v2 = vxor.u32 2147483648, %v937_v28 }
  0x9a   :  { %v754_v30 = vsel %vm752_vm13, %v753_v26, %v937_v28  ;;  %v858_v32 = vsel %vm856_vm14, %v753_v26, %v937_v28 }
  0x9b   :  { %v751_v34 = vsel %vm749_vm15, %v935_v43, %v750_v2  ;;  %v855_v41 = vsel %vm853_vm1, %v935_v43, %v750_v2 }
  0x9c   :  { %v755_v44 = vsel %vm748_vm2, %v751_v34, %v754_v30  ;;  %v859_v24 = vsel %vm852_vm3, %v855_v41, %v858_v32 }
  0x9d   :  { %v756_v22 = vsel %vm745_vm4, nan, %v755_v44  ;;  %v860_v46 = vsel %vm745_vm4, nan, %v859_v24 }
  0x9e   :  { %757 = vst.msk [vmem:[%s1322_s1 + $0x15] sm:$0x7] %vm21_vm0, %v756_v22  ;;  %861 = vst.msk [vmem:[%s1322_s1 + $0x18] sm:$0x7] %vm21_vm0, %v860_v46 }
  0x9f   :  { %866 = vsyncpa [#allocation3], 1 }

</bundles_post_ra>
